<compile_context>
chip_gen: v7x
topology: tpu7x:2x2x1
jax: 0.10.0
libtpu: 0.0.40
codegen_flags: <defaults>
</compile_context>

<pallas_src>
import functools

import jax
import jax.numpy as jnp
from jax.experimental import pallas as pl
from jax.experimental.pallas import tpu as pltpu


def _round_up(x, m):
    return (x + m - 1) // m * m


def _vmem_capacity_bytes():
    try:
        return int(pltpu.get_tpu_info().vmem_capacity_bytes)
    except Exception:
        return 64 * 1024 * 1024  # conservative default (v7x per-core VMEM)


def _pick_tile(n, num_heads, feat_pad, out_pad, vmem_budget_bytes):
    """Largest dst tile (multiple of 128, or full N when N < 128) whose kernel-2
    working set fits the per-core VMEM budget.

    Accounts for the single-buffered residents (bf16 feat, f32 el^T, bias), the
    double-buffered streamed strips (int8 mask, f32 er, f32 out) and ~3 live
    (tile, N) f32 softmax temporaries from the head loop.  Budget should already
    be per-TensorCore (residents are duplicated on both v7x cores).
    """
    n8 = _round_up(n, 8)
    if n8 <= 128:
        return n8, n8

    def working_set(tile):
        n_pad = _round_up(n, tile)
        resident = n_pad * feat_pad * 2 + num_heads * n_pad * 4 + out_pad * 4
        streamed = 2 * (tile * n_pad * 1 + tile * num_heads * 4 + tile * out_pad * 4)
        temps = 3 * tile * n_pad * 4
        return resident + streamed + temps

    best = 128
    for cand in (128, 256, 512):
        if working_set(cand) <= vmem_budget_bytes:
            best = cand
    return best, _round_up(n, best)


def _gat_proj_kernel(h_ref, w_ref, wa_ref, feat_ref, elt_ref, erd_ref, *, num_heads):
    """One node-row tile: feat = h @ W (bf16), scores = h @ (W @ A_pack)."""
    h = h_ref[...]                                              # (T, Fin) bf16
    feat = jnp.dot(h, w_ref[...], preferred_element_type=jnp.float32)
    feat_ref[...] = feat.astype(feat_ref.dtype)                 # bf16 out
    sc = jnp.dot(h, wa_ref[...], preferred_element_type=jnp.float32)  # (T, 128)
    # el (source term) transposed so the src axis lands on lanes; one small
    # XLU transpose per tile.  er (dst term) stays dst-major and compact (H lanes).
    elt_ref[...] = jnp.transpose(sc[:, 0:num_heads])            # (H, T)
    erd_ref[...] = sc[:, num_heads:2 * num_heads]               # (T, H)


def _gat_attn_kernel(feat_ref, elt_ref, erd_ref, mask_ref, b_ref, out_ref, *,
                     num_heads, out_feats, negative_slope, activation):
    """Masked per-head attention softmax + aggregation for one dst-node tile."""
    # Hoisted additive edge mask: 0 where edge, -1e30 otherwise (int8 stream).
    m_f = mask_ref[...].astype(jnp.float32)                     # (Tq, Nsrc)
    madd = jnp.where(m_f > 0, jnp.float32(0.0), jnp.float32(-1e30))

    # TODO(synk): batch the H e-map / aggregation into one (H, Tq, Nsrc) slab /
    # head-batched dot; kept as an unrolled loop (H <= 8, Fo = 4) because the
    # per-(dst, head) scalar -> sublane relayout has lowering risk and the
    # per-head slices below are known-good.
    head_outs = []
    for hd in range(num_heads):
        er_h = erd_ref[:, hd:hd + 1]                            # (Tq, 1)   dst term
        el_h = elt_ref[hd:hd + 1, :]                            # (1, Nsrc) src term
        e = er_h + el_h                                         # (Tq, Nsrc)
        e = jnp.where(e > 0, e, negative_slope * e)             # LeakyReLU
        e = e + madd                                            # edge mask
        m = jnp.max(e, axis=-1, keepdims=True)
        p = jnp.exp(e - m)
        denom = jnp.sum(p, axis=-1, keepdims=True)
        alpha = (p * pl.reciprocal(denom, approx=True)).astype(feat_ref.dtype)
        # NOTE: dst rows with zero in-edges (and padded dst rows) get a uniform
        # softmax over all sources; safe because self-loops are added and padded
        # rows are sliced off by the caller.
        f_h = feat_ref[:, hd * out_feats:(hd + 1) * out_feats]  # (Nsrc, Fo) bf16
        head_outs.append(jnp.dot(alpha, f_h, preferred_element_type=jnp.float32))

    out = head_outs[0] if num_heads == 1 else jnp.concatenate(head_outs, axis=-1)
    hfo = num_heads * out_feats
    out = out + b_ref[:, 0:hfo]                                 # bias on live lanes only
    if activation == "elu":
        # exp only on the clamped negative branch; dead pad lanes never see EUP.
        out = jnp.where(out > 0, out, jnp.exp(jnp.minimum(out, 0.0)) - 1.0)
    pad = out_ref.shape[-1] - hfo
    if pad:
        out = jnp.concatenate(
            [out, jnp.zeros((out.shape[0], pad), jnp.float32)], axis=-1)
    out_ref[...] = out


def gat_conv(h, w, attn_l, attn_r, bias, adj, *, num_heads, out_feats,
             negative_slope=0.2, activation=None):
    """One GATConv layer (eval mode). adj[i, j] = 1 iff edge j -> i."""
    n = adj.shape[0]
    fin = h.shape[1]
    hfo = num_heads * out_feats
    feat_pad = _round_up(hfo, 128)           # lane-dense projected features
    out_pad = _round_up(hfo, 128)            # lane-dense layer output
    sc_pad = _round_up(2 * num_heads, 128)   # packed attention-score lanes

    cap = _vmem_capacity_bytes()
    tile, n_pad = _pick_tile(n, num_heads, feat_pad, out_pad, int(cap * 0.45))
    vmem_limit = int(cap * 0.9)              # raise scoped VMEM limit

    # ---- host-side packing / padding (cheap, fused by XLA at trace time) ----
    h_p = jnp.zeros((n_pad, fin), jnp.bfloat16).at[:n, :].set(h.astype(jnp.bfloat16))
    w_p = jnp.zeros((fin, feat_pad), jnp.bfloat16).at[:, :hfo].set(w.astype(jnp.bfloat16))

    # Fold attention vectors into the projection: wa = W @ A_pack (trace time).
    # col h        -> el (src term, attn_l);  col H + h -> er (dst term, attn_r)
    w3 = w.reshape(fin, num_heads, out_feats)
    wa_l = jnp.einsum('fhk,hk->fh', w3, attn_l)
    wa_r = jnp.einsum('fhk,hk->fh', w3, attn_r)
    wa = jnp.zeros((fin, sc_pad), jnp.float32)
    wa = wa.at[:, :num_heads].set(wa_l).at[:, num_heads:2 * num_heads].set(wa_r)
    wa = wa.astype(jnp.bfloat16)

    b_p = jnp.zeros((1, out_pad), jnp.float32).at[:, :hfo].set(bias)

    # int8 adjacency (1 = edge j -> i); padded rows/cols are 0 (= masked out).
    mask_i8 = jnp.zeros((n_pad, n_pad), jnp.int8).at[:n, :n].set(
        (adj > 0).astype(jnp.int8))

    vmem_full = pl.BlockSpec(memory_space=pltpu.MemorySpace.VMEM)

    # ---- kernel 1: projection + packed attention scores (row-tiled) ----
    feat, el_t, er_d = pl.pallas_call(
        functools.partial(_gat_proj_kernel, num_heads=num_heads),
        out_shape=(jax.ShapeDtypeStruct((n_pad, feat_pad), jnp.bfloat16),
                   jax.ShapeDtypeStruct((num_heads, n_pad), jnp.float32),
                   jax.ShapeDtypeStruct((n_pad, num_heads), jnp.float32)),
        grid_spec=pltpu.PrefetchScalarGridSpec(
            num_scalar_prefetch=0,
            grid=(n_pad // tile,),
            in_specs=[
                pl.BlockSpec((tile, fin), lambda r: (r, 0)),   # h row strip
                vmem_full,                                     # W   (resident)
                vmem_full,                                     # W@A (resident)
            ],
            out_specs=(pl.BlockSpec((tile, feat_pad), lambda r: (r, 0)),
                       pl.BlockSpec((num_heads, tile), lambda r: (0, r)),
                       pl.BlockSpec((tile, num_heads), lambda r: (r, 0))),
        ),
        compiler_params=pltpu.CompilerParams(
            dimension_semantics=("parallel",),
            vmem_limit_bytes=vmem_limit),
    )(h_p, w_p, wa)

    # ---- kernel 2: masked attention + aggregation, tiled over dst nodes ----
    # TODO(synk): for genuinely sparse large graphs, scalar-prefetch a per-tile
    # nonzero-src-block map and skip empty blocks instead of dense N^2 softmax.
    out = pl.pallas_call(
        functools.partial(_gat_attn_kernel, num_heads=num_heads,
                          out_feats=out_feats, negative_slope=negative_slope,
                          activation=activation),
        out_shape=jax.ShapeDtypeStruct((n_pad, out_pad), jnp.float32),
        grid_spec=pltpu.PrefetchScalarGridSpec(
            num_scalar_prefetch=0,
            grid=(n_pad // tile,),
            in_specs=[
                vmem_full,                                              # feat (bf16, resident)
                vmem_full,                                              # el^T (resident)
                pl.BlockSpec((tile, num_heads), lambda q: (q, 0)),      # er strip (compact)
                pl.BlockSpec((tile, n_pad), lambda q: (q, 0)),          # int8 adjacency strip
                vmem_full,                                              # bias (resident)
            ],
            out_specs=pl.BlockSpec((tile, out_pad), lambda q: (q, 0)),
        ),
        compiler_params=pltpu.CompilerParams(
            dimension_semantics=("parallel",),   # dst tiles independent (v7x 2 TCs)
            vmem_limit_bytes=vmem_limit),
    )(feat, el_t, er_d, mask_i8, b_p)

    return out[:n, :hfo]


def init_gat_params(key, num_layers, input_dim, hidden_dim, output_dim,
                    num_heads):
    """Deterministic synthetic parameters, mirroring GAT.__init__ shapes."""
    hidden_per_head = hidden_dim // num_heads
    heads = [num_heads] * num_layers + [1]

    layer_cfgs = [(input_dim, hidden_per_head, heads[0])]
    for l in range(1, num_layers - 1):
        layer_cfgs.append((hidden_per_head * heads[l - 1], hidden_per_head,
                           heads[l]))
    layer_cfgs.append((hidden_per_head * heads[-2], output_dim, heads[-1]))

    params = []
    for (fin, fout, h) in layer_cfgs:
        key, kw, kl, kr = jax.random.split(key, 4)
        scale = 1.0 / jnp.sqrt(jnp.float32(fin))
        params.append({
            "w": jax.random.normal(kw, (fin, h * fout), jnp.float32) * scale,
            "attn_l": jax.random.normal(kl, (h, fout), jnp.float32) * 0.1,
            "attn_r": jax.random.normal(kr, (h, fout), jnp.float32) * 0.1,
            "bias": jnp.zeros((1, h * fout), jnp.float32),
            "num_heads": h,
            "out_feats": fout,
        })
    return params


def gat_forward(adj, feats, params):
    """Mirrors GAT.forward: flatten heads on hidden layers, mean on last."""
    h = feats
    h_list = []
    n_layers = len(params)
    for l, p in enumerate(params):
        act = None if l == n_layers - 1 else "elu"
        h = gat_conv(h, p["w"], p["attn_l"], p["attn_r"], p["bias"], adj,
                     num_heads=p["num_heads"], out_feats=p["out_feats"],
                     negative_slope=0.2, activation=act)
        if l != n_layers - 1:
            # h.flatten(1): heads are already concatenated on the feature axis.
            pass
        else:
            # h.mean(1): average over heads.
            h = h.reshape(h.shape[0], p["num_heads"], p["out_feats"]).mean(axis=1)
        h_list.append(h)
    return h_list, h


if __name__ == "__main__":
    num_layers = 2
    input_dim = 8
    hidden_dim = 32       # divided by num_heads inside -> 4 per head
    output_dim = 4
    num_heads = 8
    n_nodes = 16

    key = jax.random.PRNGKey(0)
    k_feat, k_adj, k_param = jax.random.split(key, 3)

    feats = jax.random.normal(k_feat, (n_nodes, input_dim), jnp.float32)
    # random sparse graph + self loops (adj[i, j] = 1 iff edge j -> i)
    adj = (jax.random.uniform(k_adj, (n_nodes, n_nodes)) < 0.3).astype(jnp.float32)
    adj = jnp.maximum(adj, jnp.eye(n_nodes, dtype=jnp.float32))

    params = init_gat_params(k_param, num_layers, input_dim, hidden_dim,
                             output_dim, num_heads)

    h_list, h_final = gat_forward(adj, feats, params)
    jax.block_until_ready(h_final)
    for hl in h_list:
        jax.block_until_ready(hl)

    assert h_list[0].shape == (n_nodes, hidden_dim)
    assert h_final.shape == (n_nodes, output_dim)
    print("KERNEL_OK")
</pallas_src>

<mosaic_0001>
module attributes {stable_mosaic.version = 11 : i64} {
  func.func @_gat_proj_kernel(%arg0: i32, %arg1: memref<16x8xbf16, #tpu.memory_space<vmem>>, %arg2: memref<8x128xbf16, #tpu.memory_space<vmem>>, %arg3: memref<8x128xbf16, #tpu.memory_space<vmem>>, %arg4: memref<16x128xbf16, #tpu.memory_space<vmem>>, %arg5: memref<8x16xf32, #tpu.memory_space<vmem>>, %arg6: memref<16x8xf32, #tpu.memory_space<vmem>>) attributes {dimension_semantics = [#tpu.dimension_semantics<parallel>], iteration_bounds = array<i64: 1>, scalar_prefetch = 0 : i64, scratch_operands = 0 : i64, tpu.core_type = #tpu.core_type<tc>, window_params = [{transform_indices = @transform_0, window_bounds = array<i64: 16, 8>}, {pipeline_mode = #tpu.pipeline_mode<synchronous>, transform_indices = @transform_1, window_bounds = array<i64: 8, 128>}, {pipeline_mode = #tpu.pipeline_mode<synchronous>, transform_indices = @transform_2, window_bounds = array<i64: 8, 128>}, {transform_indices = @transform_3, window_bounds = array<i64: 16, 128>}, {transform_indices = @transform_4, window_bounds = array<i64: 8, 16>}, {transform_indices = @transform_5, window_bounds = array<i64: 16, 8>}]} {
    %c0 = arith.constant 0 : index
    %c0_0 = arith.constant 0 : index
    %0 = vector.load %arg1[%c0, %c0_0] : memref<16x8xbf16, #tpu.memory_space<vmem>>, vector<16x8xbf16>
    %c0_1 = arith.constant 0 : index
    %c0_2 = arith.constant 0 : index
    %1 = vector.load %arg2[%c0_1, %c0_2] : memref<8x128xbf16, #tpu.memory_space<vmem>>, vector<8x128xbf16>
    %cst = arith.constant dense<0.000000e+00> : vector<16x128xf32>
    %2 = tpu.matmul %0, %1, %cst {dimension_numbers = #tpu.dot_dimension_numbers<[1], [0], [0], [1], [0, 0, 1, 1], [], []>} : vector<16x8xbf16>, vector<8x128xbf16>, vector<16x128xf32> -> vector<16x128xf32>
    %3 = arith.truncf %2 : vector<16x128xf32> to vector<16x128xbf16>
    %c0_3 = arith.constant 0 : index
    %c0_4 = arith.constant 0 : index
    %4 = vector.load %arg4[%c0_3, %c0_4] : memref<16x128xbf16, #tpu.memory_space<vmem>>, vector<16x128xbf16>
    tpu.vector_store %arg4[%c0_3, %c0_4], %3 {strides = array<i32>} : memref<16x128xbf16, #tpu.memory_space<vmem>>, vector<16x128xbf16>,
    %c0_5 = arith.constant 0 : index
    %c0_6 = arith.constant 0 : index
    %5 = vector.load %arg3[%c0_5, %c0_6] : memref<8x128xbf16, #tpu.memory_space<vmem>>, vector<8x128xbf16>
    %cst_7 = arith.constant dense<0.000000e+00> : vector<16x128xf32>
    %6 = tpu.matmul %0, %5, %cst_7 {dimension_numbers = #tpu.dot_dimension_numbers<[1], [0], [0], [1], [0, 0, 1, 1], [], []>} : vector<16x8xbf16>, vector<8x128xbf16>, vector<16x128xf32> -> vector<16x128xf32>
    %7 = vector.extract_strided_slice %6 {offsets = [0, 0], sizes = [16, 8], strides = [1, 1]} : vector<16x128xf32> to vector<16x8xf32>
    %8 = tpu.transpose %7, [1, 0] : vector<16x8xf32> -> vector<8x16xf32>
    %c0_8 = arith.constant 0 : index
    %c0_9 = arith.constant 0 : index
    %9 = vector.load %arg5[%c0_8, %c0_9] : memref<8x16xf32, #tpu.memory_space<vmem>>, vector<8x16xf32>
    tpu.vector_store %arg5[%c0_8, %c0_9], %8 {strides = array<i32>} : memref<8x16xf32, #tpu.memory_space<vmem>>, vector<8x16xf32>,
    %10 = vector.extract_strided_slice %6 {offsets = [0, 8], sizes = [16, 8], strides = [1, 1]} : vector<16x128xf32> to vector<16x8xf32>
    %c0_10 = arith.constant 0 : index
    %c0_11 = arith.constant 0 : index
    %11 = vector.load %arg6[%c0_10, %c0_11] : memref<16x8xf32, #tpu.memory_space<vmem>>, vector<16x8xf32>
    tpu.vector_store %arg6[%c0_10, %c0_11], %10 {strides = array<i32>} : memref<16x8xf32, #tpu.memory_space<vmem>>, vector<16x8xf32>,
    return
  }
  func.func @transform_0(%arg0: i32) -> (i32, i32) {
    %c0_i32 = arith.constant 0 : i32
    %c0_i32_0 = arith.constant 0 : i32
    return %arg0, %c0_i32 : i32, i32
  }
  func.func @transform_1(%arg0: i32) -> (i32, i32) {
    %c0_i32 = arith.constant 0 : i32
    %c0_i32_0 = arith.constant 0 : i32
    %c0_i32_1 = arith.constant 0 : i32
    return %c0_i32, %c0_i32_0 : i32, i32
  }
  func.func @transform_2(%arg0: i32) -> (i32, i32) {
    %c0_i32 = arith.constant 0 : i32
    %c0_i32_0 = arith.constant 0 : i32
    %c0_i32_1 = arith.constant 0 : i32
    return %c0_i32, %c0_i32_0 : i32, i32
  }
  func.func @transform_3(%arg0: i32) -> (i32, i32) {
    %c0_i32 = arith.constant 0 : i32
    %c0_i32_0 = arith.constant 0 : i32
    return %arg0, %c0_i32 : i32, i32
  }
  func.func @transform_4(%arg0: i32) -> (i32, i32) {
    %c0_i32 = arith.constant 0 : i32
    %c0_i32_0 = arith.constant 0 : i32
    return %c0_i32, %arg0 : i32, i32
  }
  func.func @transform_5(%arg0: i32) -> (i32, i32) {
    %c0_i32 = arith.constant 0 : i32
    %c0_i32_0 = arith.constant 0 : i32
    return %arg0, %c0_i32 : i32, i32
  }
}

</mosaic_0001>

<bundles_post_ra>
// kernel: tpu_custom_call.1
= control target key start
LH: loop header
LB: loop body
LE: loop exit
PB: predicated region body
PF: predicated region fallthrough
CT: control target
= control target key end

     0   :  { %11 = vsyncpa [#allocation3], 0  ;;  %vm32_vm0 = vcmask 1043456   ;;  %v294_v1 = vmov 0.0   ;;  %vm295_vm1 = vmmov 0   ;;  %vm28_vm2 = vcmask 64512   ;;  %s374_s0 = inlined_call_operand.vmem [shape: bf16[16,8], index: 0, kind: input, shape index: {}]   ;;  %s375_s1 = inlined_call_operand.vmem [shape: bf16[8,128], index: 1, kind: input, shape index: {}]   ;;  %s376_s2 = inlined_call_operand.vmem [shape: bf16[8,128], index: 2, kind: input, shape index: {}]   ;;  %s377_s3 = inlined_call_operand.hbm [shape: bf16[16,128], index: 3, kind: output, shape index: {0}]   ;;  %s378_s4 = inlined_call_operand.hbm [shape: f32[8,16], index: 4, kind: output, shape index: {1}]   ;;  %s379_s5 = inlined_call_operand.vmem [shape: f32[16,8], index: 5, kind: output, shape index: {2}]  }
   0x1   :  { %v87_v0 = vld [vmem:[%s376_s2] sm:$0xf]  ;;  %232 = vmatprep.subr.bf16.mxu1 %v294_v1  ;;  %234 = vmatprep.mubr.msk.bf16.mxu1 %vm295_vm1, %v294_v1 }
   0x2   :  { %v89_v2 = vsel %vm32_vm0, %v87_v0, 0  ;;  %v245_v3 = vld [vmem:[%s374_s0] sm:$0xff]   ;;  %226 = vmatprep.subr.bf16.mxu0 %v294_v1 }
   0x3   :  { %233 = vmatpush3.bf16.msra.mxu1 %v89_v2  ;;  %v22_v4 = vld [vmem:[%s375_s1] sm:$0xf] }
   0x4   :  { %12 = vsyncpa [#allocation5], 0  ;;  %v34_v5 = vsel %vm32_vm0, %v22_v4, 0  ;;  %228 = vmatprep.mubr.msk.bf16.mxu0 %vm295_vm1, %v294_v1  ;;  %s296_s2 = smov 120   ;;  %s297_s0 = smov [#allocation2]  }
   0x5   :  { %227 = vmatpush3.bf16.msra.mxu0 %v34_v5  ;;  %s181_s24 = sshll.u32 %s297_s0, 4  ;;  %s182_s24 = int_to_ptr.vmem [resolvable:$true] %s181_s24 }
   0x6   :  { %235 = vmatmul.mubr.msk.bf16.vlgmr.msra.gmra.mrb[0].mxu1 %vm28_vm2, %v245_v3  ;;  %s246_s1 = scalar_lea.vmem %s182_s24, 128  ;;  %p251_p1 = scmp.lt.s32.totalorder %s182_s24, %s182_s24 }
   0x7   :  { %p247_p0 = scmp.ne.s32.totalorder %s182_s24, %s246_s1  ;;  %p252_p2 = scmp.lt.s32.totalorder %s246_s1, %s246_s1 }
   0x8   :  { %229 = vmatmul.mubr.msk.bf16.vlgmr.msra.gmra.mrb[0].mxu0 %vm28_vm2, %v245_v3 }
   0x9   :  { %p253_p3 = por %p252_p2, %p251_p1 }
   0xb   :  { %p254_p4 = pnand %p253_p3, %p247_p0 }
  0xd9   :  { %v125_v6 = vpop.f32.mrb[0].mxu1 }
  0xda   :  { %132 = vxpose.xlu1.b32.start [1/2] (short) (narrow) %v125_v6, 8  ;;  %168 = vrot.lane.b32.xlu0 %v125_v6, %s296_s2  ;;  %v236_v7 = vpop.f32.mrb[1].mxu1 }
  0xdb   :  { %v128_v8 = vpop.f32.mrb[2].mxu1  ;;  %v70_v9 = vpop.f32.mrb[0].mxu0 }
  0xdc   :  { %v237_v10 = vpop.f32.mrb[3].mxu1  ;;  %v230_v11 = vpop.f32.mrb[1].mxu0 }
  0xdd   :  { %v73_v12 = vpop.f32.mrb[2].mxu0 }
  0xde   :  { %133 = vxpose.xlu1.b32.end [2/2] (short) (narrow) %v128_v8, 8  ;;  %170 = vrot.lane.b32.xlu0 %v128_v8, %s296_s2  ;;  %v220_v13 = vpack.c.bf16 %v73_v12, %v70_v9  ;;  %v231_v14 = vpop.f32.mrb[3].mxu0 }
  0xe0   :  { %221 = vst [vmem:[#allocation2] sm:$0xff] %v220_v13  }
  0xe1   :  { %257 = shalt.err (!%p254_p4)
}
  0xe2   :  { %s258_s27 = scalar_lea.hbm %s377_s3, 128 }
  0xe3   :  { %p259_p5 = scmp.ne.s32.totalorder %s377_s3, %s258_s27  ;;  %p262_p6 = scmp.lt.u32.totalorder %s258_s27, %s377_s3 }
  0xe5   :  { %p264_p7 = pnand %p262_p6, %p259_p5 }
  0xe7   :  { %267 = shalt.err (!%p264_p7)
}
  0xe8   :  { %s298_s7 = smov 64   ;;  %s299_s8 = smov 4   ;;  %vm164_vm3 = vcmask 130048  }
  0xe9   :  { %187 = dma.vmem_to_hbm [thread:$0]  %s182_s24, 128, %s377_s3, [#allocation3], %s298_s7, %s298_s7, %s299_s8  }
  0xea   :  { %s300_s15 = smov [#allocation4]  }
  0xeb   :  { %s194_s16 = sshll.u32 %s300_s15, 4  ;;  %s195_s16 = int_to_ptr.vmem [resolvable:$true] %s194_s16 }
  0xec   :  { %s268_s17 = scalar_lea.vmem %s195_s16, 128  ;;  %p273_p9 = scmp.lt.s32.totalorder %s195_s16, %s195_s16 }
  0xed   :  { %p269_p8 = scmp.ne.s32.totalorder %s195_s16, %s268_s17  ;;  %p274_p10 = scmp.lt.s32.totalorder %s268_s17, %s268_s17 }
  0xef   :  { %p275_p11 = por %p274_p10, %p273_p9 }
  0xf1   :  { %p276_p12 = pnand %p275_p11, %p269_p8 }
 0x14c   :  { %v169_v15 = vpop.permute.xlu0 %168 }
 0x14d   :  { %174 = vst.msk [vmem:[%s379_s5] sm:$0xff] %vm28_vm2, %v169_v15 }
 0x150   :  { %v171_v16 = vpop.permute.xlu0 %170 }
 0x151   :  { %175 = vst.msk [vmem:[%s379_s5 + $0x8] sm:$0xff] %vm28_vm2, %v171_v16 }
 0x15a   :  { %v148_v17 = vpop.trf.xlu1 }
 0x15b   :  { %165 = vst.msk [vmem:[#allocation4] sm:$0xff] %vm164_vm3, %v148_v17 }
 0x15c   :  { %279 = shalt.err (!%p276_p12)
}
 0x15d   :  { %s280_s19 = scalar_lea.hbm %s378_s4, 128 }
 0x15e   :  { %p281_p13 = scmp.ne.s32.totalorder %s378_s4, %s280_s19  ;;  %p284_p0 = scmp.lt.u32.totalorder %s280_s19, %s378_s4 }
 0x160   :  { %p286_p1 = pnand %p284_p0, %p281_p13 }
 0x162   :  { %289 = shalt.err (!%p286_p1)
}
 0x163   :  { %197 = dma.vmem_to_hbm [thread:$0]  %s195_s16, 128, %s378_s4, [#allocation5]  }
 0x164   :  { %290 = dma.done.wait [#allocation3], 128  }
 0x165   :  { %291 = vsyncadd [#allocation3], 4294967168 }
 0x166   :  { %292 = dma.done.wait [#allocation5], 128  }
 0x167   :  { %293 = vsyncadd [#allocation5], 4294967168 }
 0x168   :  { %208 = vsyncpa [#allocation3], 1 }
 0x169   :  { %209 = vsyncpa [#allocation5], 1 }

</bundles_post_ra>
